<compile_context>
chip_gen: v7x
topology: tpu7x:2x2x1
jax: 0.10.0
libtpu: 0.0.40
codegen_flags: <defaults>
</compile_context>

<pallas_src>
import math
from functools import partial

import jax
import jax.numpy as jnp
from jax.experimental import pallas as pl
from jax.experimental.pallas import tpu as pltpu


# ----------------------------------------------------------------------------
# Kernel
# ----------------------------------------------------------------------------
def _gelu_tanh(x):
    # tanh-approx GELU, implemented explicitly so kernel and reference match.
    return 0.5 * x * (1.0 + jnp.tanh(0.7978845608028654 * (x + 0.044715 * x * x * x)))


def _fused_kernel(x_ref, cw_ref, cb_ref, w1_ref, b1_ref, w2_ref, b2_ref,
                  out_ref, gap_ref, *, tile_h, width, inv_hw):
    # x_ref : (tile_h+2, W+2, C)  bf16  halo'd NHWC image tile (one batch item)
    # cw_ref: (9, C, Cwp)         bf16  conv weight, one (C, Cwp) slab per tap
    # cb_ref: (1, Cwp)            f32   conv bias
    # w1_ref: (Cwp, Hp)           bf16  head layer-1 (concat / block-diag T|S)
    # b1_ref: (1, Hp)             f32
    # w2_ref: (Hp, Op)            bf16  head layer-2 (block-diag T|S)
    # b2_ref: (1, Op)             f32
    # out_ref:(1, 1, Op)          f32   [teacher_out | student_out | pad]
    # gap_ref:(1, Cwp)            f32   VMEM scratch: global-avg-pool accumulator
    r = pl.program_id(1)                       # spatial tile index (reduction axis)

    @pl.when(r == 0)
    def _init():
        gap_ref[...] = jnp.zeros_like(gap_ref)

    # 3x3 "same" conv on this row-tile as nine shifted-slice matmuls
    # (bf16 MXU operands, f32 accumulation). Slices are static; the halo'd
    # tile already carries the zero padding.
    xp = x_ref[...].astype(jnp.float32)        # (tile_h+2, W+2, C)
    m = tile_h * width
    cwp = cw_ref.shape[-1]
    acc = jnp.zeros((m, cwp), jnp.float32)
    k = 0
    for dy in range(3):
        for dx in range(3):
            a = xp[dy:dy + tile_h, dx:dx + width, :].reshape(m, -1)    # (m, C)
            acc += jnp.dot(a.astype(jnp.bfloat16), cw_ref[k],
                           preferred_element_type=jnp.float32)
            k += 1
    acc = jnp.maximum(acc + cb_ref[...], 0.0)                          # bias + ReLU

    # global-average-pool accumulator (scaled by 1/HW at finalize)
    gap_ref[...] += jnp.sum(acc, axis=0, keepdims=True)                # (1, Cwp)

    # heads run once per batch item, from the in-VMEM embedding
    @pl.when(r == pl.num_programs(1) - 1)
    def _finalize():
        emb = gap_ref[...] * inv_hw                                    # (1, Cwp) f32
        h = jnp.dot(emb.astype(jnp.bfloat16), w1_ref[...],
                    preferred_element_type=jnp.float32) + b1_ref[...]  # (1, Hp)
        h = _gelu_tanh(h)
        o = jnp.dot(h.astype(jnp.bfloat16), w2_ref[...],
                    preferred_element_type=jnp.float32) + b2_ref[...]  # (1, Op)
        out_ref[...] = o.reshape(out_ref.shape)


# ----------------------------------------------------------------------------
# Weight packing (hoisted: run once per parameter update, reused every forward)
# ----------------------------------------------------------------------------
def _round_up(x, m):
    return ((x + m - 1) // m) * m


def _pad2(a, rows, cols):
    return jnp.pad(a, ((0, rows - a.shape[0]), (0, cols - a.shape[1])))


def _block_diag(a, b):
    za = jnp.zeros((a.shape[0], b.shape[1]), a.dtype)
    zb = jnp.zeros((b.shape[0], a.shape[1]), b.dtype)
    return jnp.concatenate([jnp.concatenate([a, za], axis=1),
                            jnp.concatenate([zb, b], axis=1)], axis=0)


def pack_params(student_params, teacher_params, train_backbone=False, lane=128):
    """Concat/block-diag teacher|student weights, pad to lane-dense widths, bf16."""
    C = teacher_params["conv_w"].shape[2]
    hid = teacher_params["w1"].shape[1]
    out = teacher_params["w2"].shape[1]

    if train_backbone:
        # independent backbones: emb_cat = [emb_teacher | emb_student]
        conv_w = jnp.concatenate([teacher_params["conv_w"],
                                  student_params["conv_w"]], axis=-1)   # (3,3,C,2E)
        conv_b = jnp.concatenate([teacher_params["conv_b"],
                                  student_params["conv_b"]], axis=1)
        w1 = _block_diag(teacher_params["w1"], student_params["w1"])    # (2E, 2H)
    else:
        # shared backbone (student.backbone = teacher.backbone): embed once
        conv_w = teacher_params["conv_w"]                               # (3,3,C,E)
        conv_b = teacher_params["conv_b"]
        w1 = jnp.concatenate([teacher_params["w1"],
                              student_params["w1"]], axis=1)            # (E, 2H)

    cw_n = conv_w.shape[-1]
    cwp = _round_up(cw_n, lane)
    hp = _round_up(2 * hid, lane)
    op = _round_up(2 * out, lane)

    cw = conv_w.reshape(9, C, cw_n)
    cw = jnp.pad(cw, ((0, 0), (0, 0), (0, cwp - cw_n))).astype(jnp.bfloat16)
    cb = _pad2(conv_b, 1, cwp).astype(jnp.float32)
    w1p = _pad2(w1, cwp, hp).astype(jnp.bfloat16)
    b1 = _pad2(jnp.concatenate([teacher_params["b1"], student_params["b1"]],
                               axis=1), 1, hp).astype(jnp.float32)
    w2p = _pad2(_block_diag(teacher_params["w2"], student_params["w2"]),
                hp, op).astype(jnp.bfloat16)
    b2 = _pad2(jnp.concatenate([teacher_params["b2"], student_params["b2"]],
                               axis=1), 1, op).astype(jnp.float32)
    return {"cw": cw, "cb": cb, "w1": w1p, "b1": b1, "w2": w2p, "b2": b2}


# ----------------------------------------------------------------------------
# Forward (hot path)
# ----------------------------------------------------------------------------
@partial(jax.jit, static_argnames=("out_dim", "tile_h"))
def teacher_student_forward(images_nchw, packed, *, out_dim, tile_h=8):
    """Fused Pallas implementation of TeacherStudentCombo.forward."""
    x = jnp.transpose(images_nchw, (0, 2, 3, 1)).astype(jnp.bfloat16)   # NCHW->NHWC
    B, H, W, C = x.shape
    assert H % tile_h == 0, "tile_h must divide H"
    n_tiles = H // tile_h

    # halo'd row tiles: (B, n_tiles, tile_h+2, W+2, C) — only 2 duplicated halo
    # rows per tile instead of the 9x (and 72%-zeros) im2col inflation.
    xp = jnp.pad(x, ((0, 0), (1, 1), (1, 1), (0, 0)))
    tiles = jnp.stack([xp[:, r * tile_h: r * tile_h + tile_h + 2]
                       for r in range(n_tiles)], axis=1)

    cw, cb, w1, b1, w2, b2 = (packed[k] for k in ("cw", "cb", "w1", "b1", "w2", "b2"))
    cwp = cw.shape[-1]
    hp = w1.shape[-1]
    op = w2.shape[-1]

    out = pl.pallas_call(
        partial(_fused_kernel, tile_h=tile_h, width=W, inv_hw=1.0 / (H * W)),
        out_shape=jax.ShapeDtypeStruct((B, 1, op), jnp.float32),
        grid_spec=pltpu.PrefetchScalarGridSpec(
            num_scalar_prefetch=0,
            grid=(B, n_tiles),                  # batch parallel, spatial reduction
            in_specs=[
                # image tile: double-buffered, new block every grid step
                pl.BlockSpec((None, None, tile_h + 2, W + 2, C),
                             lambda b, r: (b, r, 0, 0, 0)),
                # weights/biases: constant index_maps -> DMA'd once, VMEM-resident
                pl.BlockSpec((9, C, cwp), lambda b, r: (0, 0, 0)),
                pl.BlockSpec((1, cwp), lambda b, r: (0, 0)),
                pl.BlockSpec((cwp, hp), lambda b, r: (0, 0)),
                pl.BlockSpec((1, hp), lambda b, r: (0, 0)),
                pl.BlockSpec((hp, op), lambda b, r: (0, 0)),
                pl.BlockSpec((1, op), lambda b, r: (0, 0)),
            ],
            out_specs=pl.BlockSpec((1, 1, op), lambda b, r: (b, 0, 0)),
            scratch_shapes=[pltpu.VMEM((1, cwp), jnp.float32)],   # GAP accumulator
        ),
        compiler_params=pltpu.CompilerParams(
            dimension_semantics=("parallel", "arbitrary")),       # v7x: 2 TCs
    )(tiles, cw, cb, w1, b1, w2, b2)

    out = out.reshape(B, op)
    return out[:, :out_dim], out[:, out_dim:2 * out_dim]     # (teacher, student)


# ----------------------------------------------------------------------------
# Deterministic parameter init & pure-JAX (f32) reference
# ----------------------------------------------------------------------------
def init_student_params(key, cin, embed_dim, hidden, out_dim):
    k = jax.random.split(key, 6)
    return {
        "conv_w": jax.random.normal(k[0], (3, 3, cin, embed_dim), jnp.float32)
                  / math.sqrt(9 * cin),
        "conv_b": 0.01 * jax.random.normal(k[1], (1, embed_dim), jnp.float32),
        "w1": jax.random.normal(k[2], (embed_dim, hidden), jnp.float32)
              / math.sqrt(embed_dim),
        "b1": 0.01 * jax.random.normal(k[3], (1, hidden), jnp.float32),
        "w2": jax.random.normal(k[4], (hidden, out_dim), jnp.float32)
              / math.sqrt(hidden),
        "b2": 0.01 * jax.random.normal(k[5], (1, out_dim), jnp.float32),
    }


def _ref_forward(images_nchw, student, teacher, train_backbone=False):
    x = jnp.transpose(images_nchw, (0, 2, 3, 1))

    def backbone(p):
        y = jax.lax.conv_general_dilated(
            x, p["conv_w"], (1, 1), "SAME",
            dimension_numbers=("NHWC", "HWIO", "NHWC"))
        y = jnp.maximum(y + p["conv_b"].reshape(1, 1, 1, -1), 0.0)
        return jnp.mean(y, axis=(1, 2))

    def head(e, p):
        h = _gelu_tanh(e @ p["w1"] + p["b1"])
        return h @ p["w2"] + p["b2"]

    if train_backbone:
        return head(backbone(teacher), teacher), head(backbone(student), student)
    emb = backbone(teacher)
    return head(emb, teacher), head(emb, student)


# ----------------------------------------------------------------------------
if __name__ == "__main__":
    B, C, H, W = 2, 4, 16, 16
    EMBED, HIDDEN, OUT = 32, 32, 16
    TILE_H = 8
    TOL = dict(atol=3e-2, rtol=3e-2)   # bf16 MXU operands vs pure-f32 reference

    key = jax.random.PRNGKey(0)
    k_img, k_param, k_pert = jax.random.split(key, 3)
    images = jax.random.normal(k_img, (B, C, H, W), jnp.float32)     # NCHW, as PyTorch

    student_params = init_student_params(k_param, C, EMBED, HIDDEN, OUT)
    # teacher.load_state_dict(student.state_dict()): teacher == student at init
    teacher_params = jax.tree_util.tree_map(lambda v: v, student_params)

    # --- default path: shared backbone, teacher == student (state at __init__) ---
    packed = pack_params(student_params, teacher_params, train_backbone=False)
    t_out, s_out = teacher_student_forward(images, packed, out_dim=OUT, tile_h=TILE_H)
    jax.block_until_ready((t_out, s_out))
    t_ref, s_ref = _ref_forward(images, student_params, teacher_params, False)
    assert t_out.shape == (B, OUT) and s_out.shape == (B, OUT)
    assert jnp.allclose(t_out, t_ref, **TOL)
    assert jnp.allclose(s_out, s_ref, **TOL)

    # --- diverged student (as during training): exercises both weight routings ---
    leaves, treedef = jax.tree_util.tree_flatten(student_params)
    pert_leaves = [v + 0.05 * jax.random.normal(jax.random.fold_in(k_pert, i),
                                                v.shape, v.dtype)
                   for i, v in enumerate(leaves)]
    student_pert = jax.tree_util.tree_unflatten(treedef, pert_leaves)

    for tb in (False, True):
        packed = pack_params(student_pert, teacher_params, train_backbone=tb)
        t_out, s_out = teacher_student_forward(images, packed, out_dim=OUT,
                                               tile_h=TILE_H)
        jax.block_until_ready((t_out, s_out))
        t_ref, s_ref = _ref_forward(images, student_pert, teacher_params, tb)
        assert jnp.allclose(t_out, t_ref, **TOL)
        assert jnp.allclose(s_out, s_ref, **TOL)

    print("KERNEL_OK")
</pallas_src>

<mosaic_0001>
module attributes {stable_mosaic.version = 11 : i64} {
  func.func @_fused_kernel(%arg0: i32, %arg1: i32, %arg2: memref<1x1x10x18x4xbf16, #tpu.memory_space<vmem>>, %arg3: memref<9x4x128xbf16, #tpu.memory_space<vmem>>, %arg4: memref<1x128xf32, #tpu.memory_space<vmem>>, %arg5: memref<128x128xbf16, #tpu.memory_space<vmem>>, %arg6: memref<1x128xf32, #tpu.memory_space<vmem>>, %arg7: memref<128x128xbf16, #tpu.memory_space<vmem>>, %arg8: memref<1x128xf32, #tpu.memory_space<vmem>>, %arg9: memref<1x1x128xf32, #tpu.memory_space<vmem>>, %arg10: memref<1x128xf32, #tpu.memory_space<vmem>>) attributes {dimension_semantics = [#tpu.dimension_semantics<parallel>, #tpu.dimension_semantics<arbitrary>], iteration_bounds = array<i64: 2, 2>, scalar_prefetch = 0 : i64, scratch_operands = 1 : i64, tpu.core_type = #tpu.core_type<tc>, window_params = [{transform_indices = @transform_0, window_bounds = array<i64: 1, 1, 10, 18, 4>}, {pipeline_mode = #tpu.pipeline_mode<synchronous>, transform_indices = @transform_1, window_bounds = array<i64: 9, 4, 128>}, {pipeline_mode = #tpu.pipeline_mode<synchronous>, transform_indices = @transform_2, window_bounds = array<i64: 1, 128>}, {pipeline_mode = #tpu.pipeline_mode<synchronous>, transform_indices = @transform_3, window_bounds = array<i64: 128, 128>}, {pipeline_mode = #tpu.pipeline_mode<synchronous>, transform_indices = @transform_4, window_bounds = array<i64: 1, 128>}, {pipeline_mode = #tpu.pipeline_mode<synchronous>, transform_indices = @transform_5, window_bounds = array<i64: 128, 128>}, {pipeline_mode = #tpu.pipeline_mode<synchronous>, transform_indices = @transform_6, window_bounds = array<i64: 1, 128>}, {transform_indices = @transform_7, window_bounds = array<i64: 1, 1, 128>}]} {
    %c0_i32 = arith.constant 0 : i32
    %0 = arith.cmpi eq, %arg1, %c0_i32 : i32
    %1 = arith.extui %0 : i1 to i32
    %c0_i32_0 = arith.constant 0 : i32
    %2 = arith.cmpi ne, %1, %c0_i32_0 : i32
    scf.if %2 {
      %cst_42 = arith.constant 0.000000e+00 : f32
      %83 = vector.broadcast %cst_42 : f32 to vector<1x128xf32>
      %c0_43 = arith.constant 0 : index
      %c0_44 = arith.constant 0 : index
      %84 = vector.load %arg10[%c0_43, %c0_44] : memref<1x128xf32, #tpu.memory_space<vmem>>, vector<1x128xf32>
      tpu.vector_store %arg10[%c0_43, %c0_44], %83 {strides = array<i32>} : memref<1x128xf32, #tpu.memory_space<vmem>>, vector<1x128xf32>,
    } else {
    }
    %c0 = arith.constant 0 : index
    %c0_1 = arith.constant 0 : index
    %c0_2 = arith.constant 0 : index
    %c0_3 = arith.constant 0 : index
    %c0_4 = arith.constant 0 : index
    %3 = vector.load %arg2[%c0, %c0_1, %c0_2, %c0_3, %c0_4] : memref<1x1x10x18x4xbf16, #tpu.memory_space<vmem>>, vector<1x1x10x18x4xbf16>
    %4 = vector.shape_cast %3 : vector<1x1x10x18x4xbf16> to vector<10x18x4xbf16>
    %5 = arith.extf %4 : vector<10x18x4xbf16> to vector<10x18x4xf32>
    %cst = arith.constant 0.000000e+00 : f32
    %6 = vector.broadcast %cst : f32 to vector<128x128xf32>
    %7 = vector.extract_strided_slice %5 {offsets = [0, 0, 0], sizes = [8, 16, 4], strides = [1, 1, 1]} : vector<10x18x4xf32> to vector<8x16x4xf32>
    %8 = vector.shape_cast %7 : vector<8x16x4xf32> to vector<128x4xf32>
    %9 = arith.truncf %8 : vector<128x4xf32> to vector<128x4xbf16>
    %c0_5 = arith.constant 0 : index
    %c0_6 = arith.constant 0 : index
    %c0_7 = arith.constant 0 : index
    %10 = vector.load %arg3[%c0_5, %c0_6, %c0_7] : memref<9x4x128xbf16, #tpu.memory_space<vmem>>, vector<1x4x128xbf16>
    %11 = vector.shape_cast %10 : vector<1x4x128xbf16> to vector<4x128xbf16>
    %cst_8 = arith.constant dense<0.000000e+00> : vector<128x128xf32>
    %12 = tpu.matmul %9, %11, %cst_8 {dimension_numbers = #tpu.dot_dimension_numbers<[1], [0], [0], [1], [0, 0, 1, 1], [], []>} : vector<128x4xbf16>, vector<4x128xbf16>, vector<128x128xf32> -> vector<128x128xf32>
    %13 = arith.addf %6, %12 : vector<128x128xf32>
    %14 = vector.extract_strided_slice %5 {offsets = [0, 1, 0], sizes = [8, 16, 4], strides = [1, 1, 1]} : vector<10x18x4xf32> to vector<8x16x4xf32>
    %15 = vector.shape_cast %14 : vector<8x16x4xf32> to vector<128x4xf32>
    %16 = arith.truncf %15 : vector<128x4xf32> to vector<128x4xbf16>
    %c1 = arith.constant 1 : index
    %c0_9 = arith.constant 0 : index
    %c0_10 = arith.constant 0 : index
    %17 = vector.load %arg3[%c1, %c0_9, %c0_10] : memref<9x4x128xbf16, #tpu.memory_space<vmem>>, vector<1x4x128xbf16>
    %18 = vector.shape_cast %17 : vector<1x4x128xbf16> to vector<4x128xbf16>
    %cst_11 = arith.constant dense<0.000000e+00> : vector<128x128xf32>
    %19 = tpu.matmul %16, %18, %cst_11 {dimension_numbers = #tpu.dot_dimension_numbers<[1], [0], [0], [1], [0, 0, 1, 1], [], []>} : vector<128x4xbf16>, vector<4x128xbf16>, vector<128x128xf32> -> vector<128x128xf32>
    %20 = arith.addf %13, %19 : vector<128x128xf32>
    %21 = vector.extract_strided_slice %5 {offsets = [0, 2, 0], sizes = [8, 16, 4], strides = [1, 1, 1]} : vector<10x18x4xf32> to vector<8x16x4xf32>
    %22 = vector.shape_cast %21 : vector<8x16x4xf32> to vector<128x4xf32>
    %23 = arith.truncf %22 : vector<128x4xf32> to vector<128x4xbf16>
    %c2 = arith.constant 2 : index
    %c0_12 = arith.constant 0 : index
    %c0_13 = arith.constant 0 : index
    %24 = vector.load %arg3[%c2, %c0_12, %c0_13] : memref<9x4x128xbf16, #tpu.memory_space<vmem>>, vector<1x4x128xbf16>
    %25 = vector.shape_cast %24 : vector<1x4x128xbf16> to vector<4x128xbf16>
    %cst_14 = arith.constant dense<0.000000e+00> : vector<128x128xf32>
    %26 = tpu.matmul %23, %25, %cst_14 {dimension_numbers = #tpu.dot_dimension_numbers<[1], [0], [0], [1], [0, 0, 1, 1], [], []>} : vector<128x4xbf16>, vector<4x128xbf16>, vector<128x128xf32> -> vector<128x128xf32>
    %27 = arith.addf %20, %26 : vector<128x128xf32>
    %28 = vector.extract_strided_slice %5 {offsets = [1, 0, 0], sizes = [8, 16, 4], strides = [1, 1, 1]} : vector<10x18x4xf32> to vector<8x16x4xf32>
    %29 = vector.shape_cast %28 : vector<8x16x4xf32> to vector<128x4xf32>
    %30 = arith.truncf %29 : vector<128x4xf32> to vector<128x4xbf16>
    %c3 = arith.constant 3 : index
    %c0_15 = arith.constant 0 : index
    %c0_16 = arith.constant 0 : index
    %31 = vector.load %arg3[%c3, %c0_15, %c0_16] : memref<9x4x128xbf16, #tpu.memory_space<vmem>>, vector<1x4x128xbf16>
    %32 = vector.shape_cast %31 : vector<1x4x128xbf16> to vector<4x128xbf16>
    %cst_17 = arith.constant dense<0.000000e+00> : vector<128x128xf32>
    %33 = tpu.matmul %30, %32, %cst_17 {dimension_numbers = #tpu.dot_dimension_numbers<[1], [0], [0], [1], [0, 0, 1, 1], [], []>} : vector<128x4xbf16>, vector<4x128xbf16>, vector<128x128xf32> -> vector<128x128xf32>
    %34 = arith.addf %27, %33 : vector<128x128xf32>
    %35 = vector.extract_strided_slice %5 {offsets = [1, 1, 0], sizes = [8, 16, 4], strides = [1, 1, 1]} : vector<10x18x4xf32> to vector<8x16x4xf32>
    %36 = vector.shape_cast %35 : vector<8x16x4xf32> to vector<128x4xf32>
    %37 = arith.truncf %36 : vector<128x4xf32> to vector<128x4xbf16>
    %c4 = arith.constant 4 : index
    %c0_18 = arith.constant 0 : index
    %c0_19 = arith.constant 0 : index
    %38 = vector.load %arg3[%c4, %c0_18, %c0_19] : memref<9x4x128xbf16, #tpu.memory_space<vmem>>, vector<1x4x128xbf16>
    %39 = vector.shape_cast %38 : vector<1x4x128xbf16> to vector<4x128xbf16>
    %cst_20 = arith.constant dense<0.000000e+00> : vector<128x128xf32>
    %40 = tpu.matmul %37, %39, %cst_20 {dimension_numbers = #tpu.dot_dimension_numbers<[1], [0], [0], [1], [0, 0, 1, 1], [], []>} : vector<128x4xbf16>, vector<4x128xbf16>, vector<128x128xf32> -> vector<128x128xf32>
    %41 = arith.addf %34, %40 : vector<128x128xf32>
    %42 = vector.extract_strided_slice %5 {offsets = [1, 2, 0], sizes = [8, 16, 4], strides = [1, 1, 1]} : vector<10x18x4xf32> to vector<8x16x4xf32>
    %43 = vector.shape_cast %42 : vector<8x16x4xf32> to vector<128x4xf32>
    %44 = arith.truncf %43 : vector<128x4xf32> to vector<128x4xbf16>
    %c5 = arith.constant 5 : index
    %c0_21 = arith.constant 0 : index
    %c0_22 = arith.constant 0 : index
    %45 = vector.load %arg3[%c5, %c0_21, %c0_22] : memref<9x4x128xbf16, #tpu.memory_space<vmem>>, vector<1x4x128xbf16>
    %46 = vector.shape_cast %45 : vector<1x4x128xbf16> to vector<4x128xbf16>
    %cst_23 = arith.constant dense<0.000000e+00> : vector<128x128xf32>
    %47 = tpu.matmul %44, %46, %cst_23 {dimension_numbers = #tpu.dot_dimension_numbers<[1], [0], [0], [1], [0, 0, 1, 1], [], []>} : vector<128x4xbf16>, vector<4x128xbf16>, vector<128x128xf32> -> vector<128x128xf32>
    %48 = arith.addf %41, %47 : vector<128x128xf32>
    %49 = vector.extract_strided_slice %5 {offsets = [2, 0, 0], sizes = [8, 16, 4], strides = [1, 1, 1]} : vector<10x18x4xf32> to vector<8x16x4xf32>
    %50 = vector.shape_cast %49 : vector<8x16x4xf32> to vector<128x4xf32>
    %51 = arith.truncf %50 : vector<128x4xf32> to vector<128x4xbf16>
    %c6 = arith.constant 6 : index
    %c0_24 = arith.constant 0 : index
    %c0_25 = arith.constant 0 : index
    %52 = vector.load %arg3[%c6, %c0_24, %c0_25] : memref<9x4x128xbf16, #tpu.memory_space<vmem>>, vector<1x4x128xbf16>
    %53 = vector.shape_cast %52 : vector<1x4x128xbf16> to vector<4x128xbf16>
    %cst_26 = arith.constant dense<0.000000e+00> : vector<128x128xf32>
    %54 = tpu.matmul %51, %53, %cst_26 {dimension_numbers = #tpu.dot_dimension_numbers<[1], [0], [0], [1], [0, 0, 1, 1], [], []>} : vector<128x4xbf16>, vector<4x128xbf16>, vector<128x128xf32> -> vector<128x128xf32>
    %55 = arith.addf %48, %54 : vector<128x128xf32>
    %56 = vector.extract_strided_slice %5 {offsets = [2, 1, 0], sizes = [8, 16, 4], strides = [1, 1, 1]} : vector<10x18x4xf32> to vector<8x16x4xf32>
    %57 = vector.shape_cast %56 : vector<8x16x4xf32> to vector<128x4xf32>
    %58 = arith.truncf %57 : vector<128x4xf32> to vector<128x4xbf16>
    %c7 = arith.constant 7 : index
    %c0_27 = arith.constant 0 : index
    %c0_28 = arith.constant 0 : index
    %59 = vector.load %arg3[%c7, %c0_27, %c0_28] : memref<9x4x128xbf16, #tpu.memory_space<vmem>>, vector<1x4x128xbf16>
    %60 = vector.shape_cast %59 : vector<1x4x128xbf16> to vector<4x128xbf16>
    %cst_29 = arith.constant dense<0.000000e+00> : vector<128x128xf32>
    %61 = tpu.matmul %58, %60, %cst_29 {dimension_numbers = #tpu.dot_dimension_numbers<[1], [0], [0], [1], [0, 0, 1, 1], [], []>} : vector<128x4xbf16>, vector<4x128xbf16>, vector<128x128xf32> -> vector<128x128xf32>
    %62 = arith.addf %55, %61 : vector<128x128xf32>
    %63 = vector.extract_strided_slice %5 {offsets = [2, 2, 0], sizes = [8, 16, 4], strides = [1, 1, 1]} : vector<10x18x4xf32> to vector<8x16x4xf32>
    %64 = vector.shape_cast %63 : vector<8x16x4xf32> to vector<128x4xf32>
    %65 = arith.truncf %64 : vector<128x4xf32> to vector<128x4xbf16>
    %c8 = arith.constant 8 : index
    %c0_30 = arith.constant 0 : index
    %c0_31 = arith.constant 0 : index
    %66 = vector.load %arg3[%c8, %c0_30, %c0_31] : memref<9x4x128xbf16, #tpu.memory_space<vmem>>, vector<1x4x128xbf16>
    %67 = vector.shape_cast %66 : vector<1x4x128xbf16> to vector<4x128xbf16>
    %cst_32 = arith.constant dense<0.000000e+00> : vector<128x128xf32>
    %68 = tpu.matmul %65, %67, %cst_32 {dimension_numbers = #tpu.dot_dimension_numbers<[1], [0], [0], [1], [0, 0, 1, 1], [], []>} : vector<128x4xbf16>, vector<4x128xbf16>, vector<128x128xf32> -> vector<128x128xf32>
    %69 = arith.addf %62, %68 : vector<128x128xf32>
    %c0_33 = arith.constant 0 : index
    %c0_34 = arith.constant 0 : index
    %70 = vector.load %arg4[%c0_33, %c0_34] : memref<1x128xf32, #tpu.memory_space<vmem>>, vector<1x128xf32>
    %71 = vector.broadcast %70 : vector<1x128xf32> to vector<128x128xf32>
    %72 = arith.addf %69, %71 : vector<128x128xf32>
    %cst_35 = arith.constant 0.000000e+00 : f32
    %73 = vector.broadcast %cst_35 : f32 to vector<128x128xf32>
    %74 = arith.maximumf %72, %73 : vector<128x128xf32>
    %c0_36 = arith.constant 0 : index
    %c0_37 = arith.constant 0 : index
    %75 = vector.load %arg10[%c0_36, %c0_37] : memref<1x128xf32, #tpu.memory_space<vmem>>, vector<1x128xf32>
    %cst_38 = arith.constant dense<0.000000e+00> : vector<128xf32>
    %76 = vector.multi_reduction <add>, %74, %cst_38 [0] : vector<128x128xf32> to vector<128xf32>
    %77 = vector.shape_cast %76 : vector<128xf32> to vector<1x128xf32>
    %78 = arith.addf %75, %77 : vector<1x128xf32>
    %c0_39 = arith.constant 0 : index
    %c0_40 = arith.constant 0 : index
    %79 = vector.load %arg10[%c0_39, %c0_40] : memref<1x128xf32, #tpu.memory_space<vmem>>, vector<1x128xf32>
    tpu.vector_store %arg10[%c0_39, %c0_40], %78 {strides = array<i32>} : memref<1x128xf32, #tpu.memory_space<vmem>>, vector<1x128xf32>,
    %c1_i32 = arith.constant 1 : i32
    %80 = arith.cmpi eq, %arg1, %c1_i32 : i32
    %81 = arith.extui %80 : i1 to i32
    %c0_i32_41 = arith.constant 0 : i32
    %82 = arith.cmpi ne, %81, %c0_i32_41 : i32
    scf.if %82 {
      %c0_42 = arith.constant 0 : index
      %c0_43 = arith.constant 0 : index
      %83 = vector.load %arg10[%c0_42, %c0_43] : memref<1x128xf32, #tpu.memory_space<vmem>>, vector<1x128xf32>
      %cst_44 = arith.constant 3.906250e-03 : f32
      %84 = vector.broadcast %cst_44 : f32 to vector<1x128xf32>
      %85 = arith.mulf %83, %84 : vector<1x128xf32>
      %86 = arith.truncf %85 : vector<1x128xf32> to vector<1x128xbf16>
      %c0_45 = arith.constant 0 : index
      %c0_46 = arith.constant 0 : index
      %87 = vector.load %arg5[%c0_45, %c0_46] : memref<128x128xbf16, #tpu.memory_space<vmem>>, vector<128x128xbf16>
      %cst_47 = arith.constant dense<0.000000e+00> : vector<1x128xf32>
      %88 = tpu.matmul %86, %87, %cst_47 {dimension_numbers = #tpu.dot_dimension_numbers<[1], [0], [0], [1], [0, 0, 1, 1], [], []>} : vector<1x128xbf16>, vector<128x128xbf16>, vector<1x128xf32> -> vector<1x128xf32>
      %c0_48 = arith.constant 0 : index
      %c0_49 = arith.constant 0 : index
      %89 = vector.load %arg6[%c0_48, %c0_49] : memref<1x128xf32, #tpu.memory_space<vmem>>, vector<1x128xf32>
      %90 = arith.addf %88, %89 : vector<1x128xf32>
      %cst_50 = arith.constant 5.000000e-01 : f32
      %91 = vector.broadcast %cst_50 : f32 to vector<1x128xf32>
      %92 = arith.mulf %91, %90 : vector<1x128xf32>
      %cst_51 = arith.constant 4.471500e-02 : f32
      %93 = vector.broadcast %cst_51 : f32 to vector<1x128xf32>
      %94 = arith.mulf %93, %90 : vector<1x128xf32>
      %95 = arith.mulf %94, %90 : vector<1x128xf32>
      %96 = arith.mulf %95, %90 : vector<1x128xf32>
      %97 = arith.addf %90, %96 : vector<1x128xf32>
      %cst_52 = arith.constant 0.797884583 : f32
      %98 = vector.broadcast %cst_52 : f32 to vector<1x128xf32>
      %99 = arith.mulf %98, %97 : vector<1x128xf32>
      %100 = math.tanh %99 : vector<1x128xf32>
      %cst_53 = arith.constant 1.000000e+00 : f32
      %101 = vector.broadcast %cst_53 : f32 to vector<1x128xf32>
      %102 = arith.addf %101, %100 : vector<1x128xf32>
      %103 = arith.mulf %92, %102 : vector<1x128xf32>
      %104 = arith.truncf %103 : vector<1x128xf32> to vector<1x128xbf16>
      %c0_54 = arith.constant 0 : index
      %c0_55 = arith.constant 0 : index
      %105 = vector.load %arg7[%c0_54, %c0_55] : memref<128x128xbf16, #tpu.memory_space<vmem>>, vector<128x128xbf16>
      %cst_56 = arith.constant dense<0.000000e+00> : vector<1x128xf32>
      %106 = tpu.matmul %104, %105, %cst_56 {dimension_numbers = #tpu.dot_dimension_numbers<[1], [0], [0], [1], [0, 0, 1, 1], [], []>} : vector<1x128xbf16>, vector<128x128xbf16>, vector<1x128xf32> -> vector<1x128xf32>
      %c0_57 = arith.constant 0 : index
      %c0_58 = arith.constant 0 : index
      %107 = vector.load %arg8[%c0_57, %c0_58] : memref<1x128xf32, #tpu.memory_space<vmem>>, vector<1x128xf32>
      %108 = arith.addf %106, %107 : vector<1x128xf32>
      %109 = vector.shape_cast %108 : vector<1x128xf32> to vector<1x1x128xf32>
      %c0_59 = arith.constant 0 : index
      %c0_60 = arith.constant 0 : index
      %c0_61 = arith.constant 0 : index
      %110 = vector.load %arg9[%c0_59, %c0_60, %c0_61] : memref<1x1x128xf32, #tpu.memory_space<vmem>>, vector<1x1x128xf32>
      tpu.vector_store %arg9[%c0_59, %c0_60, %c0_61], %109 {strides = array<i32>} : memref<1x1x128xf32, #tpu.memory_space<vmem>>, vector<1x1x128xf32>,
    } else {
    }
    return
  }
  func.func @transform_0(%arg0: i32, %arg1: i32) -> (i32, i32, i32, i32, i32) {
    %c0_i32 = arith.constant 0 : i32
    %c0_i32_0 = arith.constant 0 : i32
    %c0_i32_1 = arith.constant 0 : i32
    %c0_i32_2 = arith.constant 0 : i32
    return %arg0, %arg1, %c0_i32, %c0_i32_0, %c0_i32_1 : i32, i32, i32, i32, i32
  }
  func.func @transform_1(%arg0: i32, %arg1: i32) -> (i32, i32, i32) {
    %c0_i32 = arith.constant 0 : i32
    %c0_i32_0 = arith.constant 0 : i32
    %c0_i32_1 = arith.constant 0 : i32
    %c0_i32_2 = arith.constant 0 : i32
    return %c0_i32, %c0_i32_0, %c0_i32_1 : i32, i32, i32
  }
  func.func @transform_2(%arg0: i32, %arg1: i32) -> (i32, i32) {
    %c0_i32 = arith.constant 0 : i32
    %c0_i32_0 = arith.constant 0 : i32
    %c0_i32_1 = arith.constant 0 : i32
    return %c0_i32, %c0_i32_0 : i32, i32
  }
  func.func @transform_3(%arg0: i32, %arg1: i32) -> (i32, i32) {
    %c0_i32 = arith.constant 0 : i32
    %c0_i32_0 = arith.constant 0 : i32
    %c0_i32_1 = arith.constant 0 : i32
    return %c0_i32, %c0_i32_0 : i32, i32
  }
  func.func @transform_4(%arg0: i32, %arg1: i32) -> (i32, i32) {
    %c0_i32 = arith.constant 0 : i32
    %c0_i32_0 = arith.constant 0 : i32
    %c0_i32_1 = arith.constant 0 : i32
    return %c0_i32, %c0_i32_0 : i32, i32
  }
  func.func @transform_5(%arg0: i32, %arg1: i32) -> (i32, i32) {
    %c0_i32 = arith.constant 0 : i32
    %c0_i32_0 = arith.constant 0 : i32
    %c0_i32_1 = arith.constant 0 : i32
    return %c0_i32, %c0_i32_0 : i32, i32
  }
  func.func @transform_6(%arg0: i32, %arg1: i32) -> (i32, i32) {
    %c0_i32 = arith.constant 0 : i32
    %c0_i32_0 = arith.constant 0 : i32
    %c0_i32_1 = arith.constant 0 : i32
    return %c0_i32, %c0_i32_0 : i32, i32
  }
  func.func @transform_7(%arg0: i32, %arg1: i32) -> (i32, i32, i32) {
    %c0_i32 = arith.constant 0 : i32
    %c0_i32_0 = arith.constant 0 : i32
    %c0_i32_1 = arith.constant 0 : i32
    return %arg0, %c0_i32, %c0_i32_0 : i32, i32, i32
  }
}

</mosaic_0001>

<bundles_post_ra>
// kernel: teacher_student_forward.1
= control target key start
LH: loop header
LB: loop body
LE: loop exit
PB: predicated region body
PF: predicated region fallthrough
CT: control target
= control target key end

     0   :  { %s2772_s24 = smov 0   ;;  %s2774_s25 = smov 0   ;;  %s3294_s0 = inlined_call_operand.vmem [shape: bf16[2,2,10,18,4], index: 0, kind: input, shape index: {}]   ;;  %s3295_s1 = inlined_call_operand.vmem [shape: bf16[9,4,128], index: 1, kind: input, shape index: {}]   ;;  %s3296_s2 = inlined_call_operand.vmem [shape: f32[1,128], index: 2, kind: input, shape index: {}]   ;;  %s3297_s3 = inlined_call_operand.vmem [shape: bf16[128,128], index: 3, kind: input, shape index: {}]   ;;  %s3298_s4 = inlined_call_operand.vmem [shape: f32[1,128], index: 4, kind: input, shape index: {}]   ;;  %s3299_s5 = inlined_call_operand.vmem [shape: bf16[128,128], index: 5, kind: input, shape index: {}]   ;;  %s3300_s6 = inlined_call_operand.vmem [shape: f32[1,128], index: 6, kind: input, shape index: {}]   ;;  %s3301_s7 = inlined_call_operand.vmem [shape: f32[2,1,128], index: 7, kind: output, shape index: {}]  }
   0x1   :  { %s2776_s26 = smov 0   ;;  %s2778_s27 = smov 0  }
   0x2   :  { %s2780_s28 = smov 0  }
   0x3 LB: > { %s26_s29 = sadd.s32 1, %s2719_s26  ;;  %s29_s30 = sadd.s32 1, %s2723_s27  ;;  %s2727_s28 = sphi %s2780_s28, %s17_s28   ;;  %s2723_s27 = sphi %s2778_s27, %s3305_s27   ;;  %s2719_s26 = sphi %s2776_s26, %s3304_s26   ;;  %s2715_s25 = sphi %s2774_s25, %s3303_s25   ;;  %s2711_s24 = sphi %s2772_s24, %s3302_s24  }
   0x4   : > { %p27_p0 = scmp.ge.s32.totalorder %s26_s29, 2  ;;  %p2052_p1 = scmp.ge.s32.totalorder %s2727_s28, 1 }
   0x5   : > { %p255_p2 = scmp.lt.s32.totalorder %s2727_s28, 5 }
   0x6   : > { %s3307_s29 = smov (%p27_p0, %s26_s29), 0  ;;  %s3309_s30 = smov (!%p27_p0, %s29_s30), %s2723_s27 }
   0x7   : > { %p256_p3 = pnand %p2052_p1, %p255_p2  ;;  %p31_p4 = scmp.ge.s32.totalorder %s3309_s30, 2 }
   0x8   : > { %p289_p5 = scmp.lt.s32.totalorder (!%p256_p3), %s2715_s25, 1  ;;  %p291_p6 = scmp.lt.s32.totalorder (!%p256_p3), %s2711_s24, 1 }
   0x9   : > { %s3311_s30 = smov (%p31_p4, %s3309_s30), 0  ;;  %259 = sbr.rel (%p256_p3) target bundleno = 886 (0x376), region = 48 }
   0xa   : > { %p2054_p7 = scmp.ne.s32.totalorder (!%p256_p3), %s2711_s24, 0 }
  0x10   : > { %s3313_s25 = smov (!%p289_p5, %s2715_s25), 1  ;;  %v2729_v0 = vmov (!%p2054_p7), 0.0  }
  0x11   : > { %s292_s8 = scalar_select %p291_p6, %s2711_s24, 1 }
  0x12   : > { %s2607_s9 = smul.u32 60, %s3313_s25  ;;  %s300_s12 = scalar_lea.vmem %s3301_s7, %s3313_s25  ;;  %306 = vst [vmem:[#allocation2] sm:$0x1] (!%p2054_p7), %v2729_v0 }
  0x13   : > { %s2606_s13 = smul.u32 30, %s292_s8 }
  0x14   : > { %305 = sbr.rel (%p2054_p7) target bundleno = 27 (0x1b), region = 52 }
  0x15   : > { %s295_s14 = sadd.s32 %s2607_s9, %s2606_s13 }
  0x16   : > { %s2053_s15 = sshll.u32 %s295_s14, 2 }
  0x17   : > { %s2816_s18 = scalar_lea.vmem %s3294_s0, %s2053_s15 }
  0x1b PF: > { %v2063_v1 = vld [vmem:[%s3295_s1 + $0x2] sm:$0x3]  ;;  %vm492_vm0 = vcmask 1041408   ;;  %v2825_v2 = vld [vmem:[%s3295_s1 + $0x8] sm:$0x3]  ;;  %vm400_vm1 = vcmask 1046528  }
  0x1c   : > { %v2828_v3 = vld [vmem:[%s2816_s18] sm:$0xff]   ;;  %2596 = vmatprep.subr.msk.bf16.mxu1 %vm492_vm0, %v2063_v1  ;;  %2600 = vmatprep.subr.msk.bf16.mxu0 %vm492_vm0, %v2825_v2  ;;  %v494_v4 = vsel %vm492_vm0, %v2063_v1, 0  ;;  %v2836_v5 = vsel %vm492_vm0, %v2825_v2, 0  ;;  %v2839_v6 = vld [vmem:[%s2816_s18 + $0x8] sm:$0x1]  ;;  %v2849_v11 = vld [vmem:[%s2816_s18 + $0xc] sm:$0xff]  }
  0x1d   : > { %v337_v7 = vunpack.c.l.bf16 %v2828_v3  ;;  %v338_v8 = vunpack.c.h.bf16 %v2828_v3  ;;  %v375_v9 = vld [vmem:[%s3295_s1] sm:$0x3]  ;;  %2265 = vmatpush3.bf16.msra.mxu1 %v494_v4  ;;  %2337 = vmatpush3.bf16.msra.mxu0 %v2836_v5  ;;  %v339_v10 = vunpack.c.l.bf16 %v2839_v6  ;;  %v312_v12 = vld [vmem:[%s2816_s18 + $0x14] sm:$0x1]  ;;  %v2108_v15 = vld [vmem:[%s3295_s1 + $0xa] sm:$0x3]  ;;  %v340_v17 = vunpack.c.l.bf16 %v2849_v11 }
  0x1e   : > { %2597 = vmatprep.subr.msk.bf16.mxu1 %vm492_vm0, %v375_v9  ;;  %v341_v18 = vunpack.c.h.bf16 %v2849_v11  ;;  %2602 = vmatprep.subr.msk.bf16.mxu0 %vm492_vm0, %v2108_v15  ;;  %v2866_v19 = vld [vmem:[%s2816_s18 + $0x18] sm:$0xff]   ;;  %v342_v21 = vunpack.c.l.bf16 %v312_v12  ;;  %v2870_v22 = vld [vmem:[%s2816_s18 + $0x20] sm:$0x1]  ;;  %vm467_vm2 = vcmask 31744   ;;  %v2875_v27 = vld [vmem:[%s2816_s18 + $0x24] sm:$0xff]   ;;  %v618_v30 = vsel %vm492_vm0, %v375_v9, 0 }
  0x1f   : > { %v401_v13 = vrot.slane %v337_v7, 1  ;;  %v402_v14 = vrot.slane %v338_v8, 1  ;;  %v404_v16 = vrot.slane %v339_v10, 1  ;;  %v343_v23 = vunpack.c.l.bf16 %v2866_v19  ;;  %v2884_v35 = vld [vmem:[%s2816_s18 + $0x2c] sm:$0x1]  ;;  %v2890_v40 = vld [vmem:[%s2816_s18 + $0x30] sm:$0xff]  }
  0x20   : > { %v406_v25 = vrot.slane %v340_v17, 1  ;;  %v407_v26 = vrot.slane %v341_v18, 1  ;;  %v409_v29 = vrot.slane %v342_v21, 1  ;;  %v344_v32 = vunpack.c.h.bf16 %v2866_v19  ;;  %v2893_v45 = vld [vmem:[%s2816_s18 + $0x38] sm:$0x1]  ;;  %v2899_v50 = vld [vmem:[%s2816_s18 + $0x3c] sm:$0xff]  }
  0x21   : > { %v403_v20 = vsel %vm400_vm1, %v401_v13, %v402_v14  ;;  %v405_v24 = vsel %vm400_vm1, %v402_v14, %v404_v16  ;;  %v345_v33 = vunpack.c.l.bf16 %v2870_v22  ;;  %v411_v34 = vrot.slane %v343_v23, 1  ;;  %v2904_v51 = vld [vmem:[%s3295_s1 + $0x4] sm:$0x3]  ;;  %v2918_v60 = vld [vmem:[%s3295_s1 + $0xc] sm:$0x3]  ;;  %p2146_p8 = scmp.ne.s32.totalorder %s2711_s24, 1 }
  0x22   : > { %v457_v28 = vpack.c.bf16 %v405_v24, %v403_v20  ;;  %v408_v31 = vsel %vm400_vm1, %v406_v25, %v407_v26  ;;  %v410_v36 = vsel %vm400_vm1, %v407_v26, %v409_v29  ;;  %v723_v37 = vrot.slane %v340_v17, 2  ;;  %v2925_v63 = vld [vmem:[%s2816_s18 + $0x44] sm:$0x1]  ;;  %v2945_v17 = vld [vmem:[%s2816_s18 + $0x48] sm:$0xff]   ;;  %v2954_v22 = vld [vmem:[%s2816_s18 + $0x50] sm:$0x1] }
  0x23   : > { %v724_v38 = vrot.slane %v341_v18, 2  ;;  %v346_v39 = vunpack.c.l.bf16 %v2875_v27  ;;  %v458_v41 = vpack.c.bf16 %v410_v36, %v408_v31  ;;  %v726_v42 = vrot.slane %v342_v21, 2 }
  0x24   : > { %2266 = vmatprep.mubr.msk.bf16.mxu1 %vm467_vm2, %v457_v28  ;;  %v412_v43 = vrot.slane %v344_v32, 1  ;;  %v414_v44 = vrot.slane %v345_v33, 1  ;;  %v1192_v46 = vsel %vm492_vm0, %v2108_v15, 0  ;;  %v347_v47 = vunpack.c.h.bf16 %v2875_v27 }
  0x25   : > { %v348_v48 = vunpack.c.l.bf16 %v2884_v35  ;;  %v416_v49 = vrot.slane %v346_v39, 1  ;;  %2338 = vmatprep.mubr.msk.bf16.mxu0 %vm467_vm2, %v458_v41  ;;  %2267 = vmatmul.mubr.msk.bf16.vlgmr.msra.gmra.mrb[0].mxu1 %vm467_vm2, %v458_v41  ;;  %v349_v54 = vunpack.c.l.bf16 %v2890_v40  ;;  %v350_v55 = vunpack.c.h.bf16 %v2890_v40  ;;  %v2966_v35 = vld [vmem:[%s2816_s18 + $0x54] sm:$0xff]  }
  0x26   : > { %v413_v52 = vsel %vm400_vm1, %v411_v34, %v412_v43  ;;  %v415_v53 = vsel %vm400_vm1, %v412_v43, %v414_v44  ;;  %2283 = vmatpush3.bf16.msra.mxu1 %v618_v30  ;;  %v417_v57 = vrot.slane %v347_v47, 1  ;;  %v351_v59 = vunpack.c.l.bf16 %v2893_v45 }
  0x27   : > { %v2912_v56 = vpack.c.bf16 %v415_v53, %v413_v52  ;;  %v419_v58 = vrot.slane %v348_v48, 1  ;;  %v421_v61 = vrot.slane %v349_v54, 1  ;;  %v422_v62 = vrot.slane %v350_v55, 1  ;;  %2598 = vmatprep.subr.msk.bf16.mxu1 %vm492_vm0, %v2904_v51 }
  0x28   : > { %vm717_vm3 = vcmask 1045504   ;;  %v352_v0 = vunpack.c.l.bf16 %v2899_v50  ;;  %v418_v1 = vsel %vm400_vm1, %v416_v49, %v417_v57  ;;  %v424_v9 = vrot.slane %v351_v59, 1 }
  0x29   : > { %2339 = vmatmul.mubr.msk.bf16.vlgmr.msra.gmra.mrb[0].mxu0 %vm467_vm2, %v2912_v56  ;;  %2270 = vmatprep.mubr.msk.bf16.mxu1 %vm467_vm2, %v2912_v56  ;;  %v420_v4 = vsel %vm400_vm1, %v417_v57, %v419_v58  ;;  %v725_v12 = vsel %vm717_vm3, %v723_v37, %v724_v38  ;;  %v423_v14 = vsel %vm400_vm1, %v421_v61, %v422_v62  ;;  %v353_v16 = vunpack.c.h.bf16 %v2899_v50  ;;  %v330_v37 = vld [vmem:[%s2816_s18 + $0x5c] sm:$0x1] }
  0x2a   : > { %2355 = vmatpush3.bf16.msra.mxu0 %v1192_v46  ;;  %v2939_v13 = vpack.c.bf16 %v420_v4, %v418_v1  ;;  %v727_v15 = vsel %vm717_vm3, %v724_v38, %v726_v42  ;;  %v425_v18 = vsel %vm400_vm1, %v422_v62, %v424_v9  ;;  %v354_v20 = vunpack.c.l.bf16 %v2925_v63 }
  0x2b   : > { %2603 = vmatprep.subr.msk.bf16.mxu0 %vm492_vm0, %v2918_v60  ;;  %v426_v21 = vrot.slane %v352_v0, 1  ;;  %v728_v24 = vrot.slane %v343_v23, 2  ;;  %v729_v25 = vrot.slane %v344_v32, 2  ;;  %v731_v26 = vrot.slane %v345_v33, 2 }
  0x2c   : > { %2342 = vmatprep.mubr.msk.bf16.mxu0 %vm467_vm2, %v2939_v13  ;;  %v427_v28 = vrot.slane %v353_v16, 1  ;;  %v2960_v29 = vpack.c.bf16 %v425_v18, %v423_v14  ;;  %v2962_v30 = vpack.c.bf16 %v727_v15, %v725_v12  ;;  %v429_v31 = vrot.slane %v354_v20, 1 }
  0x2d   : > { %v355_v34 = vunpack.c.l.bf16 %v2945_v17  ;;  %2271 = vmatmul.mubr.msk.bf16.gmra.mrb[4].mxu1 %vm467_vm2, %v2939_v13  ;;  %v356_v32 = vunpack.c.h.bf16 %v2945_v17  ;;  %v357_v33 = vunpack.c.l.bf16 %v2954_v22  ;;  %v733_v36 = vrot.slane %v346_v39, 2 }
  0x2e   : > { %v428_v23 = vsel %vm400_vm1, %v426_v21, %v427_v28  ;;  %2274 = vmatprep.mubr.msk.bf16.mxu1 %vm467_vm2, %v2960_v29  ;;  %v430_v38 = vsel %vm400_vm1, %v427_v28, %v429_v31  ;;  %v734_v42 = vrot.slane %v347_v47, 2  ;;  %v736_v43 = vrot.slane %v348_v48, 2 }
  0x2f   : > { %v431_v41 = vrot.slane %v355_v34, 1  ;;  %v730_v44 = vsel %vm717_vm3, %v728_v24, %v729_v25  ;;  %v432_v46 = vrot.slane %v356_v32, 1  ;;  %v434_v49 = vrot.slane %v357_v33, 1 }
  0x30   : > { %v358_v52 = vunpack.c.l.bf16 %v2966_v35  ;;  %v2981_v53 = vpack.c.bf16 %v430_v38, %v428_v23  ;;  %v732_v39 = vsel %vm717_vm3, %v729_v25, %v731_v26  ;;  %v359_v57 = vunpack.c.h.bf16 %v2966_v35 }
  0x31   : > { %2343 = vmatmul.mubr.msk.bf16.gmra.mrb[4].mxu0 %vm467_vm2, %v2960_v29  ;;  %v360_v58 = vunpack.c.l.bf16 %v330_v37  ;;  %v433_v47 = vsel %vm400_vm1, %v431_v41, %v432_v46  ;;  %v435_v48 = vsel %vm400_vm1, %v432_v46, %v434_v49  ;;  %v735_v61 = vsel %vm717_vm3, %v733_v36, %v734_v42 }
  0x32   : > { %2356 = vmatprep.mubr.msk.bf16.mxu0 %vm467_vm2, %v2962_v30  ;;  %v737_v62 = vsel %vm717_vm3, %v734_v42, %v736_v43  ;;  %v2991_v63 = vpack.c.bf16 %v435_v48, %v433_v47  ;;  %v436_v1 = vrot.slane %v358_v52, 1  ;;  %v437_v4 = vrot.slane %v359_v57, 1  ;;  %v3036_v43 = vld [vmem:[%s2816_s18 + $0x60] sm:$0xff]  }
  0x33   : > { %v439_v9 = vrot.slane %v360_v58, 1  ;;  %v2993_v12 = vpack.c.bf16 %v732_v39, %v730_v44  ;;  %v1314_v14 = vsel %vm492_vm0, %v2918_v60, 0  ;;  %v2997_v15 = vpack.c.bf16 %v737_v62, %v735_v61  ;;  %v3039_v44 = vld [vmem:[%s2816_s18 + $0x68] sm:$0x1]  ;;  %v2090_v47 = vld [vmem:[%s3295_s1 + $0x6] sm:$0x3] }
  0x34   : > { %v738_v18 = vrot.slane %v349_v54, 2  ;;  %v739_v21 = vrot.slane %v350_v55, 2  ;;  %v741_v22 = vrot.slane %v351_v59, 2  ;;  %v743_v24 = vrot.slane %v352_v0, 2  ;;  %v2127_v54 = vld [vmem:[%s3295_s1 + $0xe] sm:$0x3] }
  0x35   : > { %2275 = vmatmul.mubr.msk.bf16.gmra.mrb[8].mxu1 %vm467_vm2, %v2981_v53  ;;  %v438_v60 = vsel %vm400_vm1, %v436_v1, %v437_v4  ;;  %v440_v25 = vsel %vm400_vm1, %v437_v4, %v439_v9  ;;  %v744_v26 = vrot.slane %v353_v16, 2  ;;  %v746_v28 = vrot.slane %v354_v20, 2 }
  0x36   : > { %2278 = vmatprep.mubr.msk.bf16.mxu1 %vm467_vm2, %v2991_v63  ;;  %v3020_v45 = vpack.c.bf16 %v440_v25, %v438_v60  ;;  %v740_v55 = vsel %vm717_vm3, %v738_v18, %v739_v21  ;;  %v742_v59 = vsel %vm717_vm3, %v739_v21, %v741_v22  ;;  %v748_v31 = vrot.slane %v355_v34, 2  ;;  %v336_v25 = vld [vmem:[%s2816_s18 + $0x74] sm:$0x1] }
  0x37   : > { %v745_v0 = vsel %vm717_vm3, %v743_v24, %v744_v26  ;;  %v747_v16 = vsel %vm717_vm3, %v744_v26, %v746_v28  ;;  %v3027_v20 = vpack.c.bf16 %v742_v59, %v740_v55  ;;  %v749_v23 = vrot.slane %v356_v32, 2 }
  0x38   : > { %v3031_v36 = vpack.c.bf16 %v747_v16, %v745_v0  ;;  %v751_v37 = vrot.slane %v357_v33, 2  ;;  %v753_v38 = vrot.slane %v358_v52, 2  ;;  %v754_v41 = vrot.slane %v359_v57, 2 }
  0x39   : > { %2357 = vmatmul.mubr.msk.bf16.vlgmr.msra.gmra.mrb[0].mxu0 %vm467_vm2, %v2993_v12  ;;  %v756_v42 = vrot.slane %v360_v58, 2  ;;  %v750_v34 = vsel %vm717_vm3, %v748_v31, %v749_v23  ;;  %v361_v33 = vunpack.c.l.bf16 %v3036_v43  ;;  %v362_v46 = vunpack.c.h.bf16 %v3036_v43 }
  0x3a   : > { %2373 = vmatpush3.bf16.msra.mxu0 %v1314_v14  ;;  %2360 = vmatprep.mubr.msk.bf16.mxu0 %vm467_vm2, %v2997_v15  ;;  %v752_v32 = vsel %vm717_vm3, %v749_v23, %v751_v37  ;;  %v363_v49 = vunpack.c.l.bf16 %v3039_v44  ;;  %v755_v52 = vsel %vm717_vm3, %v753_v38, %v754_v41  ;;  %v809_v57 = vsel %vm492_vm0, %v2904_v51, 0 }
  0x3b   : > { %2604 = vmatprep.subr.msk.bf16.mxu0 %vm492_vm0, %v2127_v54  ;;  %v757_v39 = vsel %vm717_vm3, %v754_v41, %v756_v42  ;;  %v3054_v58 = vpack.c.bf16 %v752_v32, %v750_v34  ;;  %v1178_v61 = vrot.slane %v361_v33, 2  ;;  %v1179_v62 = vrot.slane %v362_v46, 2  ;;  %v3201_v41 = vld [vmem:[%s3296_s2] ss:$0 sm:$0xff] }
  0x3c   : > { %v3061_v48 = vpack.c.bf16 %v757_v39, %v755_v52  ;;  %v1181_v1 = vrot.slane %v363_v49, 2  ;;  %v718_v14 = vrot.slane %v337_v7, 2  ;;  %v719_v18 = vrot.slane %v338_v8, 2  ;;  %v334_v8 = vld [vmem:[%s2816_s18 + $0x6c] sm:$0xff]  }
  0x3d   : > { %2279 = vmatmul.mubr.msk.bf16.gmra.mrb[12].mxu1 %vm467_vm2, %v3020_v45  ;;  %v1180_v51 = vsel %vm717_vm3, %v1178_v61, %v1179_v62  ;;  %v721_v21 = vrot.slane %v339_v10, 2  ;;  %v1446_v22 = vsel %vm492_vm0, %v2127_v54, 0  ;;  %v931_v7 = vsel %vm492_vm0, %v2090_v47, 0 }
  0x3e   : > { %2284 = vmatprep.mubr.msk.bf16.mxu1 %vm467_vm2, %v2828_v3  ;;  %v1182_v4 = vsel %vm717_vm3, %v1179_v62, %v1181_v1  ;;  %v720_v24 = vsel %vm717_vm3, %v718_v14, %v719_v18  ;;  %v2136_v3 = vld [vmem:[%s3295_s1 + $0x10] sm:$0x3]  ;;  %v1049_v10 = vrot.slane %v361_v33, 1  ;;  %v365_v26 = vunpack.c.h.bf16 %v334_v8 }
  0x3f   : > { %v3074_v9 = vpack.c.bf16 %v1182_v4, %v1180_v51  ;;  %v722_v60 = vsel %vm717_vm3, %v719_v18, %v721_v21  ;;  %vm2731_vm4 = vmmov (!%p2146_p8), 0  }
  0x40   : > { %v774_v6 = vpack.c.bf16 %v722_v60, %v720_v24  ;;  %v1433_v55 = vrot.slane %v365_v26, 1 }
  0x41   : > { %2361 = vmatmul.mubr.msk.bf16.gmra.mrb[4].mxu0 %vm467_vm2, %v3027_v20 }
  0x42   : > { %2364 = vmatprep.mubr.msk.bf16.mxu0 %vm467_vm2, %v3031_v36 }
  0x45   : > { %2285 = vmatmul.mubr.msk.bf16.vlgmr.msra.gmra.mrb[0].mxu1 %vm467_vm2, %v2849_v11 }
  0x46   : > { %2301 = vmatpush3.bf16.msra.mxu1 %v809_v57  ;;  %2288 = vmatprep.mubr.msk.bf16.mxu1 %vm467_vm2, %v2866_v19 }
  0x47   : > { %2599 = vmatprep.subr.msk.bf16.mxu1 %vm492_vm0, %v2090_v47 }
  0x49   : > { %2365 = vmatmul.mubr.msk.bf16.gmra.mrb[8].mxu0 %vm467_vm2, %v3054_v58 }
  0x4a   : > { %2368 = vmatprep.mubr.msk.bf16.mxu0 %vm467_vm2, %v3061_v48 }
  0x4d   : > { %2289 = vmatmul.mubr.msk.bf16.gmra.mrb[4].mxu1 %vm467_vm2, %v2875_v27 }
  0x4e   : > { %2292 = vmatprep.mubr.msk.bf16.mxu1 %vm467_vm2, %v2890_v40 }
  0x51   : > { %2369 = vmatmul.mubr.msk.bf16.gmra.mrb[12].mxu0 %vm467_vm2, %v3074_v9 }
  0x52   : > { %2374 = vmatprep.mubr.msk.bf16.mxu0 %vm467_vm2, %v2866_v19 }
  0x55   : > { %2293 = vmatmul.mubr.msk.bf16.gmra.mrb[8].mxu1 %vm467_vm2, %v2899_v50 }
  0x56   : > { %2296 = vmatprep.mubr.msk.bf16.mxu1 %vm467_vm2, %v2945_v17 }
  0x59   : > { %2375 = vmatmul.mubr.msk.bf16.vlgmr.msra.gmra.mrb[0].mxu0 %vm467_vm2, %v2875_v27 }
  0x5a   : > { %2391 = vmatpush3.bf16.msra.mxu0 %v1446_v22  ;;  %2378 = vmatprep.mubr.msk.bf16.mxu0 %vm467_vm2, %v2890_v40 }
  0x5b   : > { %2605 = vmatprep.subr.msk.bf16.mxu0 %vm492_vm0, %v2136_v3 }
  0x5d   : > { %2297 = vmatmul.mubr.msk.bf16.gmra.mrb[12].mxu1 %vm467_vm2, %v2966_v35 }
  0x5e   : > { %2302 = vmatprep.mubr.msk.bf16.mxu1 %vm467_vm2, %v774_v6 }
  0x61   : > { %2379 = vmatmul.mubr.msk.bf16.gmra.mrb[4].mxu0 %vm467_vm2, %v2899_v50 }
  0x62   : > { %2382 = vmatprep.mubr.msk.bf16.mxu0 %vm467_vm2, %v2945_v17 }
  0x65   : > { %2303 = vmatmul.mubr.msk.bf16.vlgmr.msra.gmra.mrb[0].mxu1 %vm467_vm2, %v2962_v30  ;;  %v1052_v30 = vrot.slane %v363_v49, 1 }
  0x66   : > { %2319 = vmatpush3.bf16.msra.mxu1 %v931_v7  ;;  %2306 = vmatprep.mubr.msk.bf16.mxu1 %vm467_vm2, %v2993_v12 }
  0x67   : > { %2601 = vmatprep.subr.msk.bf16.mxu1 %vm492_vm0, %v2825_v2  ;;  %v1575_v2 = vsel %vm492_vm0, %v2136_v3, 0 }
  0x69   : > { %2383 = vmatmul.mubr.msk.bf16.gmra.mrb[8].mxu0 %vm467_vm2, %v2966_v35 }
  0x6a   : > { %2386 = vmatprep.mubr.msk.bf16.mxu0 %vm467_vm2, %v3036_v43 }
  0x6d   : > { %2307 = vmatmul.mubr.msk.bf16.gmra.mrb[4].mxu1 %vm467_vm2, %v2997_v15 }
  0x6e   : > { %2310 = vmatprep.mubr.msk.bf16.mxu1 %vm467_vm2, %v3027_v20 }
  0x71   : > { %2387 = vmatmul.mubr.msk.bf16.gmra.mrb[12].mxu0 %vm467_vm2, %v334_v8 }
  0x72   : > { %2392 = vmatprep.mubr.msk.bf16.mxu0 %vm467_vm2, %v2912_v56  ;;  %v1050_v56 = vrot.slane %v362_v46, 1 }
  0x74   : > { %v1051_v28 = vsel %vm400_vm1, %v1049_v10, %v1050_v56  ;;  %v1053_v54 = vsel %vm400_vm1, %v1050_v56, %v1052_v30 }
  0x75   : > { %2311 = vmatmul.mubr.msk.bf16.gmra.mrb[8].mxu1 %vm467_vm2, %v3031_v36  ;;  %v1056_v59 = vpack.c.bf16 %v1053_v54, %v1051_v28 }
  0x76   : > { %2314 = vmatprep.mubr.msk.bf16.mxu1 %vm467_vm2, %v3054_v58 }
  0x79   : > { %2393 = vmatmul.mubr.msk.bf16.vlgmr.msra.gmra.mrb[0].mxu0 %vm467_vm2, %v2939_v13  ;;  %v364_v13 = vunpack.c.l.bf16 %v334_v8 }
  0x7a   : > { %2409 = vmatpush3.bf16.msra.mxu0 %v1575_v2  ;;  %2396 = vmatprep.mubr.msk.bf16.mxu0 %vm467_vm2, %v2960_v29  ;;  %v366_v29 = vunpack.c.l.bf16 %v336_v25 }
  0x7c   : > { %v1435_v0 = vrot.slane %v366_v29, 1 }
  0x7d   : > { %2315 = vmatmul.mubr.msk.bf16.gmra.mrb[12].mxu1 %vm467_vm2, %v3061_v48 }
  0x7e   : > { %2320 = vmatprep.mubr.msk.bf16.mxu1 %vm467_vm2, %v2849_v11  ;;  %v1432_v11 = vrot.slane %v364_v13, 1  ;;  %v1436_v31 = vsel %vm400_vm1, %v1433_v55, %v1435_v0 }
  0x80   : > { %v1434_v16 = vsel %vm400_vm1, %v1432_v11, %v1433_v55 }
  0x81   : > { %2397 = vmatmul.mubr.msk.bf16.gmra.mrb[4].mxu0 %vm467_vm2, %v2981_v53  ;;  %v1439_v23 = vpack.c.bf16 %v1436_v31, %v1434_v16 }
  0x82   : > { %2400 = vmatprep.mubr.msk.bf16.mxu0 %vm467_vm2, %v2991_v63 }
  0x85   : > { %2321 = vmatmul.mubr.msk.bf16.vlgmr.msra.gmra.mrb[0].mxu1 %vm467_vm2, %v2866_v19  ;;  %v1562_v19 = vrot.slane %v365_v26, 2 }
  0x86   : > { %2467 = vmatpush3.bf16.msra.mxu1 %v2836_v5  ;;  %2324 = vmatprep.mubr.msk.bf16.mxu1 %vm467_vm2, %v2875_v27  ;;  %v1561_v5 = vrot.slane %v364_v13, 2  ;;  %v1564_v27 = vrot.slane %v366_v29, 2 }
  0x89   : > { %2401 = vmatmul.mubr.msk.bf16.gmra.mrb[8].mxu0 %vm467_vm2, %v3020_v45 }
  0x8a   : > { %2404 = vmatprep.mubr.msk.bf16.mxu0 %vm467_vm2, %v1056_v59 }
  0x8d   : > { %2325 = vmatmul.mubr.msk.bf16.gmra.mrb[4].mxu1 %vm467_vm2, %v2890_v40  ;;  %v1563_v40 = vsel %vm717_vm3, %v1561_v5, %v1562_v19 }
  0x8e   : > { %2328 = vmatprep.mubr.msk.bf16.mxu1 %vm467_vm2, %v2899_v50  ;;  %v1565_v50 = vsel %vm717_vm3, %v1562_v19, %v1564_v27 }
  0x91   : > { %2405 = vmatmul.mubr.msk.bf16.gmra.mrb[12].mxu0 %vm467_vm2, %v1439_v23 }
  0x92   : > { %2410 = vmatprep.mubr.msk.bf16.mxu0 %vm467_vm2, %v2993_v12 }
  0x95   : > { %2329 = vmatmul.mubr.msk.bf16.gmra.mrb[8].mxu1 %vm467_vm2, %v2945_v17  ;;  %v1568_v17 = vpack.c.bf16 %v1565_v50, %v1563_v40 }
  0x96   : > { %2332 = vmatprep.mubr.msk.bf16.mxu1 %vm467_vm2, %v2966_v35 }
  0x99   : > { %2411 = vmatmul.mubr.msk.bf16.vlgmr.msra.gmra.mrb[0].mxu0 %vm467_vm2, %v2997_v15 }
  0x9a   : > { %2414 = vmatprep.mubr.msk.bf16.mxu0 %vm467_vm2, %v3027_v20 }
  0x9d   : > { %2333 = vmatmul.mubr.msk.bf16.gmra.mrb[12].mxu1 %vm467_vm2, %v3036_v43 }
  0x9e   : > { %2346 = vmatprep.mubr.msk.bf16.mxu1 %vm467_vm2, %v2981_v53 }
  0xa1   : > { %2415 = vmatmul.mubr.msk.bf16.gmra.mrb[4].mxu0 %vm467_vm2, %v3031_v36 }
  0xa2   : > { %2418 = vmatprep.mubr.msk.bf16.mxu0 %vm467_vm2, %v3054_v58 }
  0xa5   : > { %2347 = vmatmul.mubr.msk.bf16.vlgmr.msra.gmra.mrb[8].mxu1 %vm467_vm2, %v2991_v63 }
  0xa6   : > { %2350 = vmatprep.mubr.msk.bf16.mxu1 %vm467_vm2, %v3020_v45 }
  0xa9   : > { %2419 = vmatmul.mubr.msk.bf16.gmra.mrb[8].mxu0 %vm467_vm2, %v3061_v48 }
  0xaa   : > { %2422 = vmatprep.mubr.msk.bf16.mxu0 %vm467_vm2, %v3074_v9 }
  0xad   : > { %2351 = vmatmul.mubr.msk.bf16.gmra.mrb[12].mxu1 %vm467_vm2, %v1056_v59 }
  0xb1   : > { %2423 = vmatmul.mubr.msk.bf16.gmra.mrb[12].mxu0 %vm467_vm2, %v1568_v17 }
 0x158   : > { %v2322_v35 = vpop.f32.mrb[0].mxu1 }
 0x159   : > { %v967_v53 = vpop.f32.mrb[1].mxu1 }
 0x15a   : > { %v2323_v63 = vpop.f32.mrb[2].mxu1 }
 0x15b   : > { %v970_v12 = vpop.f32.mrb[3].mxu1 }
 0x160   : > { %v2326_v15 = vpop.f32.mrb[4].mxu1 }
 0x161   : > { %v983_v45 = vpop.f32.mrb[5].mxu1 }
 0x162   : > { %v2327_v20 = vpop.f32.mrb[6].mxu1 }
 0x163   : > { %v986_v36 = vpop.f32.mrb[7].mxu1 }
 0x16c   : > { %v2412_v37 = vpop.f32.mrb[0].mxu0 }
 0x16d   : > { %v2468_v38 = vadd.f32 %v2412_v37, %v2322_v35  ;;  %v1611_v42 = vpop.f32.mrb[1].mxu0 }
 0x16e   : > { %v2469_v43 = vadd.f32 %v1611_v42, %v967_v53  ;;  %v2413_v44 = vpop.f32.mrb[2].mxu0 }
 0x16f   : > { %v2470_v34 = vadd.f32 %v2413_v44, %v2323_v63  ;;  %v1614_v32 = vpop.f32.mrb[3].mxu0  ;;  %v1699_v49 = vadd.f32 %v2468_v38, %v3201_v41 }
 0x170   : > { %v1697_v33 = vadd.f32 %v2469_v43, %v3201_v41  ;;  %v2471_v46 = vadd.f32 %v1614_v32, %v970_v12 }
 0x171   : > { %v1700_v57 = vadd.f32 %v2470_v34, %v3201_v41  ;;  %v1715_v62 = vmax.f32 %v1699_v49, 0.0 }
 0x172   : > { %v1698_v52 = vadd.f32 %v2471_v46, %v3201_v41  ;;  %v1713_v39 = vmax.f32 %v1697_v33, 0.0 }
 0x173   : > { %v1716_v18 = vmax.f32 %v1700_v57, 0.0 }
 0x174   : > { %v1714_v58 = vmax.f32 %v1698_v52, 0.0  ;;  %v2416_v47 = vpop.f32.mrb[4].mxu0 }
 0x175   : > { %v2472_v48 = vadd.f32 %v2416_v47, %v2326_v15  ;;  %v1627_v61 = vpop.f32.mrb[5].mxu0 }
 0x176   : > { %v1730_v1 = vadd.f32 %v1714_v58, %v1713_v39  ;;  %v2473_v51 = vadd.f32 %v1627_v61, %v983_v45  ;;  %v2417_v4 = vpop.f32.mrb[6].mxu0 }
 0x177   : > { %v2474_v9 = vadd.f32 %v2417_v4, %v2327_v20  ;;  %v1630_v14 = vpop.f32.mrb[7].mxu0  ;;  %v1703_v3 = vadd.f32 %v2472_v48, %v3201_v41 }
 0x178   : > { %v1731_v21 = vadd.f32 %v1730_v1, %v1715_v62  ;;  %v1701_v22 = vadd.f32 %v2473_v51, %v3201_v41  ;;  %v2475_v24 = vadd.f32 %v1630_v14, %v986_v36  ;;  %v2348_v60 = vpop.f32.mrb[8].mxu1 }
 0x179   : > { %v1131_v2 = vpop.f32.mrb[9].mxu1  ;;  %v1704_v30 = vadd.f32 %v2474_v9, %v3201_v41  ;;  %v1719_v54 = vmax.f32 %v1703_v3, 0.0 }
 0x17a   : > { %v1717_v6 = vmax.f32 %v1701_v22, 0.0  ;;  %v1732_v7 = vadd.f32 %v1731_v21, %v1716_v18  ;;  %v1702_v8 = vadd.f32 %v2475_v24, %v3201_v41  ;;  %v2349_v10 = vpop.f32.mrb[10].mxu1 }
 0x17b   : > { %v1134_v26 = vpop.f32.mrb[11].mxu1  ;;  %v1720_v31 = vmax.f32 %v1704_v30, 0.0  ;;  %v2674_v30 = vld [vmem:[%s3297_s3 + $0x18] sm:$0xff] (!%p2146_p8)  }
 0x17c   : > { %v1733_v56 = vadd.f32 %v1732_v7, %v1717_v6  ;;  %v1718_v25 = vmax.f32 %v1702_v8, 0.0  ;;  %v2420_v13 = vpop.f32.mrb[8].mxu0  ;;  %v1729_v6 = vld [vmem:[#allocation2] sm:$0x1] }
 0x17d   : > { %v2476_v29 = vadd.f32 %v2420_v13, %v2348_v60  ;;  %v1643_v28 = vpop.f32.mrb[9].mxu0  ;;  %v2675_v13 = vld [vmem:[%s3297_s3 + $0x20] sm:$0xff] (!%p2146_p8)  }
 0x17e   : > { %v1734_v11 = vadd.f32 %v1733_v56, %v1718_v25  ;;  %v2477_v55 = vadd.f32 %v1643_v28, %v1131_v2  ;;  %v2421_v59 = vpop.f32.mrb[10].mxu0  ;;  %v2730_v2 = vmov (!%p2146_p8), 0.0   ;;  %v2673_v56 = vld [vmem:[%s3297_s3 + $0x10] sm:$0xff] (!%p2146_p8)   ;;  %v2679_v25 = vld [vmem:[%s3299_s5] sm:$0xff] (!%p2146_p8)  }
 0x17f   : > { %v2478_v0 = vadd.f32 %v2421_v59, %v2349_v10  ;;  %v1646_v16 = vpop.f32.mrb[11].mxu0  ;;  %v1707_v40 = vadd.f32 %v2476_v29, %v3201_v41  ;;  %2426 = vmatprep.subr.bf16.mxu0 (!%p2146_p8), %v2730_v2  ;;  %2446 = vmatprep.subr.bf16.mxu1 (!%p2146_p8), %v2730_v2  ;;  %v2672_v10 = vld [vmem:[%s3297_s3 + $0x8] sm:$0xff] (!%p2146_p8)   ;;  %v2677_v29 = vld [vmem:[%s3297_s3 + $0x30] sm:$0xff] (!%p2146_p8)  }
 0x180   : > { %v1735_v23 = vadd.f32 %v1734_v11, %v1719_v54  ;;  %v1705_v5 = vadd.f32 %v2477_v55, %v3201_v41  ;;  %v2479_v19 = vadd.f32 %v1646_v16, %v1134_v26  ;;  %v2352_v27 = vpop.f32.mrb[12].mxu1  ;;  %2442 = vmatprep.mubr.msk.bf16.mxu0 (!%p2146_p8), %vm2731_vm4, %v2730_v2  ;;  %2462 = vmatprep.mubr.msk.bf16.mxu1 (!%p2146_p8), %vm2731_vm4, %v2730_v2  ;;  %v2676_v26 = vld [vmem:[%s3297_s3 + $0x28] sm:$0xff] (!%p2146_p8)   ;;  %v2678_v11 = vld [vmem:[%s3297_s3 + $0x38] sm:$0xff] (!%p2146_p8)  }
 0x181   : > { %v1147_v53 = vpop.f32.mrb[13].mxu1  ;;  %v1708_v15 = vadd.f32 %v2478_v0, %v3201_v41  ;;  %v1723_v42 = vmax.f32 %v1707_v40, 0.0  ;;  %2447 = vmatpush3.bf16.msra.mxu1 (!%p2146_p8), %v2679_v25  ;;  %v2680_v59 = vld [vmem:[%s3299_s5 + $0x8] sm:$0xff] (!%p2146_p8)   ;;  %v2681_v0 = vld [vmem:[%s3299_s5 + $0x10] sm:$0xff] (!%p2146_p8)   ;;  %v2682_v16 = vld [vmem:[%s3299_s5 + $0x18] sm:$0xff] (!%p2146_p8)  }
 0x182   : > { %v1721_v50 = vmax.f32 %v1705_v5, 0.0  ;;  %v1736_v17 = vadd.f32 %v1735_v23, %v1720_v31  ;;  %v1706_v35 = vadd.f32 %v2479_v19, %v3201_v41  ;;  %v2353_v63 = vpop.f32.mrb[14].mxu1  ;;  %2448 = vmatprep.subr.bf16.mxu1 (!%p2146_p8), %v2730_v2  ;;  %v2683_v31 = vld [vmem:[%s3299_s5 + $0x20] sm:$0xff] (!%p2146_p8)   ;;  %v2684_v23 = vld [vmem:[%s3299_s5 + $0x28] sm:$0xff] (!%p2146_p8)   ;;  %v2685_v5 = vld [vmem:[%s3299_s5 + $0x30] sm:$0xff] (!%p2146_p8)  }
 0x183   : > { %v1150_v36 = vpop.f32.mrb[15].mxu1  ;;  %v1724_v46 = vmax.f32 %v1708_v15, 0.0  ;;  %v2686_v19 = vld [vmem:[%s3299_s5 + $0x38] sm:$0xff] (!%p2146_p8)  }
 0x184   : > { %v1737_v12 = vadd.f32 %v1736_v17, %v1721_v50  ;;  %v1722_v45 = vmax.f32 %v1706_v35, 0.0  ;;  %v2424_v20 = vpop.f32.mrb[12].mxu0 }
 0x185   : > { %v2480_v37 = vadd.f32 %v2424_v20, %v2352_v27  ;;  %v1659_v38 = vpop.f32.mrb[13].mxu0  ;;  %2449 = vmatpush3.bf16.msra.mxu1 (!%p2146_p8), %v2680_v59  ;;  %v1776_v27 = vld [vmem:[%s3298_s4] sm:$0x1] (!%p2146_p8) }
 0x186   : > { %v1738_v43 = vadd.f32 %v1737_v12, %v1722_v45  ;;  %v2481_v44 = vadd.f32 %v1659_v38, %v1147_v53  ;;  %v2425_v34 = vpop.f32.mrb[14].mxu0  ;;  %2450 = vmatprep.subr.bf16.mxu1 (!%p2146_p8), %v2730_v2 }
 0x187   : > { %v2482_v32 = vadd.f32 %v2425_v34, %v2353_v63  ;;  %v1662_v33 = vpop.f32.mrb[15].mxu0  ;;  %v1711_v57 = vadd.f32 %v2480_v37, %v3201_v41 }
 0x188   : > { %v1739_v49 = vadd.f32 %v1738_v43, %v1723_v42  ;;  %v1709_v52 = vadd.f32 %v2481_v44, %v3201_v41  ;;  %v2483_v39 = vadd.f32 %v1662_v33, %v1150_v36  ;;  %v1891_v44 = vld [vmem:[%s3300_s6] sm:$0x1] (!%p2146_p8) }
 0x189   : > { %v1712_v62 = vadd.f32 %v2482_v32, %v3201_v41  ;;  %v1727_v51 = vmax.f32 %v1711_v57, 0.0  ;;  %2451 = vmatpush3.bf16.msra.mxu1 (!%p2146_p8), %v2681_v0 }
 0x18a   : > { %v1725_v58 = vmax.f32 %v1709_v52, 0.0  ;;  %v1740_v47 = vadd.f32 %v1739_v49, %v1724_v46  ;;  %v1710_v48 = vadd.f32 %v2483_v39, %v3201_v41  ;;  %v2671_v41 = vld [vmem:[%s3297_s3] sm:$0xff] (!%p2146_p8)   ;;  %2452 = vmatprep.subr.bf16.mxu1 (!%p2146_p8), %v2730_v2 }
 0x18b   : > { %v1728_v9 = vmax.f32 %v1712_v62, 0.0  ;;  %2427 = vmatpush3.bf16.msra.mxu0 (!%p2146_p8), %v2671_v41 }
 0x18c   : > { %v1741_v61 = vadd.f32 %v1740_v47, %v1725_v58  ;;  %v1726_v1 = vmax.f32 %v1710_v48, 0.0  ;;  %2428 = vmatprep.subr.bf16.mxu0 (!%p2146_p8), %v2730_v2 }
 0x18d   : > { %2453 = vmatpush3.bf16.msra.mxu1 (!%p2146_p8), %v2682_v16 }
 0x18e   : > { %v1742_v4 = vadd.f32 %v1741_v61, %v1726_v1  ;;  %2454 = vmatprep.subr.bf16.mxu1 (!%p2146_p8), %v2730_v2 }
 0x18f   : > { %2429 = vmatpush3.bf16.msra.mxu0 (!%p2146_p8), %v2672_v10 }
 0x190   : > { %v1743_v14 = vadd.f32 %v1742_v4, %v1727_v51  ;;  %2430 = vmatprep.subr.bf16.mxu0 (!%p2146_p8), %v2730_v2 }
 0x191   : > { %2455 = vmatpush3.bf16.msra.mxu1 (!%p2146_p8), %v2683_v31 }
 0x192   : > { %v1744_v18 = vadd.f32 %v1743_v14, %v1728_v9  ;;  %2456 = vmatprep.subr.bf16.mxu1 (!%p2146_p8), %v2730_v2 }
 0x193   : > { %2431 = vmatpush3.bf16.msra.mxu0 (!%p2146_p8), %v2673_v56 }
 0x194   : > { %v1745_v21 = vrot.slane %v1744_v18, 4  ;;  %2432 = vmatprep.subr.bf16.mxu0 (!%p2146_p8), %v2730_v2 }
 0x195   : > { %2457 = vmatpush3.bf16.msra.mxu1 (!%p2146_p8), %v2684_v23 }
 0x196   : > { %v1746_v22 = vadd.f32 %v1745_v21, %v1744_v18  ;;  %2458 = vmatprep.subr.bf16.mxu1 (!%p2146_p8), %v2730_v2 }
 0x197   : > { %2433 = vmatpush3.bf16.msra.mxu0 (!%p2146_p8), %v2674_v30 }
 0x198   : > { %v1747_v24 = vrot.slane %v1746_v22, 2  ;;  %2434 = vmatprep.subr.bf16.mxu0 (!%p2146_p8), %v2730_v2 }
 0x199   : > { %2459 = vmatpush3.bf16.msra.mxu1 (!%p2146_p8), %v2685_v5 }
 0x19a   : > { %v1748_v60 = vadd.f32 %v1747_v24, %v1746_v22  ;;  %2460 = vmatprep.subr.bf16.mxu1 (!%p2146_p8), %v2730_v2 }
 0x19b   : > { %2435 = vmatpush3.bf16.msra.mxu0 (!%p2146_p8), %v2675_v13 }
 0x19c   : > { %v1749_v3 = vrot.slane %v1748_v60, 1  ;;  %1756 = sbr.rel (%p2146_p8) target bundleno = 886 (0x376), region = 56  ;;  %2436 = vmatprep.subr.bf16.mxu0 (!%p2146_p8), %v2730_v2 }
 0x19d   : > { %2461 = vmatpush3.bf16.msra.mxu1 (!%p2146_p8), %v2686_v19 }
 0x19e   : > { %v1750_v7 = vadd.f32 %v1749_v3, %v1748_v60 }
 0x19f   : > { %2437 = vmatpush3.bf16.msra.mxu0 (!%p2146_p8), %v2676_v26 }
 0x1a0   : > { %v1751_v8 = vadd.f32 %v1750_v7, %v1729_v6  ;;  %2438 = vmatprep.subr.bf16.mxu0 (!%p2146_p8), %v2730_v2 }
 0x1a2   : > { %1752 = vst [vmem:[#allocation2] sm:$0x1] %v1751_v8 }
 0x1a3   : > { %2439 = vmatpush3.bf16.msra.mxu0 %v2677_v29 }
 0x1a4   : > { %2440 = vmatprep.subr.bf16.mxu0 %v2730_v2 }
 0x1a7   : > { %2441 = vmatpush3.bf16.msra.mxu0 %v2678_v11 }
 0x1a9   : > { %v1757_v28 = vld [vmem:[#allocation2] sm:$0x1] }
 0x1aa   : > { %v1758_v54 = vmul.f32 0.00390625, %v1757_v28 }
 0x1ac   : > { %v1759_v55 = vpack.c.bf16 %v1758_v54, %v1758_v54 }
 0x1ae   : > { %2443 = vmatmul.mubr.bf16.vlgmr.msra.gmra.mrb[0].mxu0 %v1759_v55 }
 0x281   : > { %v1859_v40 = vpop.f32.mrb[0].mxu0 }
 0x282   : > { %v1860_v50 = vadd.f32 %v1859_v40, %v1776_v27  ;;  %v2444_v17 = vpop.f32.mrb[1].mxu0 }
 0x283   : > { %v1862_v35 = vpop.f32.mrb[2].mxu0 }
 0x284   : > { %v1866_v53 = vmul.f32 0.044715, %v1860_v50  ;;  %v2445_v63 = vpop.f32.mrb[3].mxu0  ;;  %v1865_v37 = vmul.f32 0.5, %v1860_v50 }
 0x286   : > { %v1867_v12 = vmul.f32 %v1866_v53, %v1860_v50 }
 0x288   : > { %v1868_v15 = vmul.f32 %v1867_v12, %v1860_v50 }
 0x28a   : > { %v1869_v45 = vadd.f32 %v1868_v15, %v1860_v50 }
 0x28c   : > { %v1870_v20 = vmul.f32 0.7978846, %v1869_v45 }
 0x28e   : > { %2687 = vtanh.f32 %v1870_v20 }
 0x298   : > { %v2688_v36 = vpop.eup %2687 }
 0x299   : > { %v1872_v38 = vadd.f32 1.0, %v2688_v36 }
 0x29b   : > { %v1873_v42 = vmul.f32 %v1872_v38, %v1865_v37 }
 0x29d   : > { %v1874_v43 = vpack.c.bf16 %v1873_v42, %v1873_v42 }
 0x29f   : > { %2463 = vmatmul.mubr.bf16.vlgmr.msra.gmra.mrb[0].mxu1 %v1874_v43 }
 0x372   : > { %v1974_v34 = vpop.f32.mrb[0].mxu1 }
 0x373   : > { %v1975_v32 = vadd.f32 %v1974_v34, %v1891_v44  ;;  %v2464_v33 = vpop.f32.mrb[1].mxu1 }
 0x374   : > { %v1977_v46 = vpop.f32.mrb[2].mxu1 }
 0x375   : > { %1980 = vst [vmem:[%s300_s12] sm:$0x1] %v1975_v32  ;;  %v2465_v49 = vpop.f32.mrb[3].mxu1 }
 0x376 PF: > { %s17_s28 = sadd.s32 1, %s2727_s28   ;;  %s3302_s24 = smov %s2719_s26 }
 0x377   : > { %p14_p9 = scmp.ge.s32.totalorder %s17_s28, 6   ;;  %s3303_s25 = smov %s2723_s27 }
 0x378   : > { %s3304_s26 = smov %s3307_s29  ;;  %s3305_s27 = smov %s3311_s30 }
 0x379   :  { %16 = sbr.rel (!%p14_p9) target bundleno = 3 (0x3), region = 94 }

</bundles_post_ra>
